<compile_context>
chip_gen: v6e
topology: v6e:2x2x1
jax: 0.10.0
libtpu: 0.0.40
codegen_flags: <defaults>
</compile_context>

<pallas_src>
import jax
import jax.numpy as jnp
from jax import lax
from jax.experimental import pallas as pl
from jax.experimental.pallas import tpu as pltpu


def _encoder_kernel(feats_ref, adj_ref, w1_ref, w2_ref, z_ref):
    x = feats_ref[...]          # [N, F] f32
    a = adj_ref[...]            # [N, N] f32
    w1 = w1_ref[...]            # [F, H] f32
    w2 = w2_ref[...]            # [H, E] f32

    a_bf = a.astype(jnp.bfloat16)

    # GCN layer 1: relu(A @ (X @ W1))  -- bf16 MXU operands, f32 accumulation.
    xw1 = jnp.dot(x.astype(jnp.bfloat16), w1.astype(jnp.bfloat16),
                  preferred_element_type=jnp.float32)
    h1 = jnp.dot(a_bf, xw1.astype(jnp.bfloat16),
                 preferred_element_type=jnp.float32)
    h1 = jnp.maximum(h1, 0.0)                      # ReLU in f32 (VPU)

    # GCN layer 2 (no activation): A @ (H1 @ W2)
    hw2 = jnp.dot(h1.astype(jnp.bfloat16), w2.astype(jnp.bfloat16),
                  preferred_element_type=jnp.float32)
    mean = jnp.dot(a_bf, hw2.astype(jnp.bfloat16),
                   preferred_element_type=jnp.float32)

    # NonLinear('relu')  (gae=True => Z = mean)
    z_ref[...] = jnp.maximum(mean, 0.0)            # [N, E] f32


def _inner_product_kernel(zl_ref, zr_ref, out_ref):
    # out[i, j] block = Z_i @ Z_j^T, contracting the minor (E) dim directly so
    # no transposed copy of Z is materialized.
    zl = zl_ref[...].astype(jnp.bfloat16)          # [tm, E]
    zr = zr_ref[...].astype(jnp.bfloat16)          # [tn, E]
    out_ref[...] = lax.dot_general(
        zl, zr,
        dimension_numbers=(((1,), (1,)), ((), ())),
        preferred_element_type=jnp.float32)


def _pick_tile(n, preferred):
    """Largest multiple-of-128 divisor of n that is <= preferred (else n)."""
    if n <= preferred:
        return n
    t = preferred
    while t >= 128:
        if n % t == 0:
            return t
        t -= 128
    return n


def vgae_forward(feats, adj, w1, w2, *, tm_pref=256, tn_pref=512):
    n, f = feats.shape
    h = w1.shape[1]
    e = w2.shape[1]
    assert adj.shape == (n, n)
    assert w1.shape == (f, h) and w2.shape == (h, e)

    # ---- Stage 1: encoder + final ReLU -> Z = [N, E] ----
    # TODO(synk): for very large N the dense A[N, N] no longer fits in VMEM and
    # this stage would need row-tiling of A; fine for the sizes used here.
    enc_cost = pl.CostEstimate(
        flops=2 * (n * f * h + n * n * h + n * h * e + n * n * e),
        transcendentals=0,
        bytes_accessed=4 * (n * f + n * n + f * h + h * e + n * e),
    )
    z = pl.pallas_call(
        _encoder_kernel,
        out_shape=jax.ShapeDtypeStruct((n, e), jnp.float32),
        in_specs=[pl.BlockSpec(memory_space=pltpu.MemorySpace.VMEM)] * 4,
        out_specs=pl.BlockSpec(memory_space=pltpu.MemorySpace.VMEM),
        compiler_params=pltpu.CompilerParams(
            vmem_limit_bytes=48 * 1024 * 1024),
        cost_estimate=enc_cost,
    )(feats, adj, w1, w2)

    # ---- Stage 2: adj_logits = Z @ Z.T, (i, j)-tiled over the N x N output ----
    tm = _pick_tile(n, tm_pref)
    tn = _pick_tile(n, tn_pref)
    ip_cost = pl.CostEstimate(
        flops=2 * n * n * e,
        transcendentals=0,
        bytes_accessed=4 * (n * n + 2 * n * e),
    )
    adj_logits = pl.pallas_call(
        _inner_product_kernel,
        out_shape=jax.ShapeDtypeStruct((n, n), jnp.float32),
        grid=(n // tm, n // tn),
        in_specs=[
            pl.BlockSpec((tm, e), lambda i, j: (i, 0)),
            pl.BlockSpec((tn, e), lambda i, j: (j, 0)),
        ],
        out_specs=pl.BlockSpec((tm, tn), lambda i, j: (i, j)),
        compiler_params=pltpu.CompilerParams(
            dimension_semantics=("parallel", "parallel")),
        cost_estimate=ip_cost,
    )(z, z)
    return adj_logits


def glorot_uniform(key, shape):
    fan_in, fan_out = shape
    limit = jnp.sqrt(6.0 / (fan_in + fan_out))
    return jax.random.uniform(key, shape, jnp.float32, -limit, limit)


def reference_forward(feats, adj, w1, w2):
    h1 = jnp.maximum(adj @ (feats @ w1), 0.0)
    mean = adj @ (h1 @ w2)
    z = jnp.maximum(mean, 0.0)
    return z @ z.T


if __name__ == "__main__":
    # Small, TPU-friendly shapes: nodes, dim_feats, n_hidden, n_embed.
    N, F, H, E = 128, 32, 32, 16

    key = jax.random.PRNGKey(0)
    k_x, k_a, k_w1, k_w2 = jax.random.split(key, 4)

    feats = jax.random.normal(k_x, (N, F), jnp.float32)

    # Symmetric, row-normalized dense adjacency with self-loops.
    a_raw = (jax.random.uniform(k_a, (N, N)) < 0.05).astype(jnp.float32)
    a_sym = jnp.maximum(a_raw, a_raw.T) + jnp.eye(N, dtype=jnp.float32)
    deg = jnp.sum(a_sym, axis=1, keepdims=True)
    adj = a_sym / deg

    # Glorot-initialized GCN weights (bias=False per module config).
    w1 = glorot_uniform(k_w1, (F, H))
    w2 = glorot_uniform(k_w2, (H, E))

    out = vgae_forward(feats, adj, w1, w2)
    out = jax.block_until_ready(out)

    ref = reference_forward(feats, adj, w1, w2)
    assert out.shape == (N, N)
    # bf16 MXU operands with f32 accumulation -> loosened tolerance vs f32 ref.
    max_err = float(jnp.max(jnp.abs(out - ref)))
    assert jnp.allclose(out, ref, atol=5e-2, rtol=5e-2), (
        f"mismatch vs reference; max abs diff = {max_err}")

    # TODO(synk): dropout / norm / optional input-output linear layers and the
    # gae=False reparameterization branch are disabled by the chosen config, so
    # they are intentionally omitted.
    print("KERNEL_OK")
</pallas_src>

<mosaic_0001>
module attributes {stable_mosaic.version = 11 : i64} {
  func.func @_encoder_kernel(%arg0: memref<128x32xf32, #tpu.memory_space<vmem>>, %arg1: memref<128x128xf32, #tpu.memory_space<vmem>>, %arg2: memref<32x32xf32, #tpu.memory_space<vmem>>, %arg3: memref<32x16xf32, #tpu.memory_space<vmem>>, %arg4: memref<128x16xf32, #tpu.memory_space<vmem>>) attributes {dimension_semantics = [], scalar_prefetch = 0 : i64, scratch_operands = 0 : i64, tpu.core_type = #tpu.core_type<tc>} {
    %c0 = arith.constant 0 : index
    %c0_0 = arith.constant 0 : index
    %0 = vector.load %arg0[%c0, %c0_0] : memref<128x32xf32, #tpu.memory_space<vmem>>, vector<128x32xf32>
    %c0_1 = arith.constant 0 : index
    %c0_2 = arith.constant 0 : index
    %1 = vector.load %arg1[%c0_1, %c0_2] : memref<128x128xf32, #tpu.memory_space<vmem>>, vector<128x128xf32>
    %c0_3 = arith.constant 0 : index
    %c0_4 = arith.constant 0 : index
    %2 = vector.load %arg2[%c0_3, %c0_4] : memref<32x32xf32, #tpu.memory_space<vmem>>, vector<32x32xf32>
    %c0_5 = arith.constant 0 : index
    %c0_6 = arith.constant 0 : index
    %3 = vector.load %arg3[%c0_5, %c0_6] : memref<32x16xf32, #tpu.memory_space<vmem>>, vector<32x16xf32>
    %4 = arith.truncf %1 : vector<128x128xf32> to vector<128x128xbf16>
    %5 = arith.truncf %0 : vector<128x32xf32> to vector<128x32xbf16>
    %6 = arith.truncf %2 : vector<32x32xf32> to vector<32x32xbf16>
    %cst = arith.constant dense<0.000000e+00> : vector<128x32xf32>
    %7 = tpu.matmul %5, %6, %cst {dimension_numbers = #tpu.dot_dimension_numbers<[1], [0], [0], [1], [0, 0, 1, 1], [], []>} : vector<128x32xbf16>, vector<32x32xbf16>, vector<128x32xf32> -> vector<128x32xf32>
    %8 = arith.truncf %7 : vector<128x32xf32> to vector<128x32xbf16>
    %cst_7 = arith.constant dense<0.000000e+00> : vector<128x32xf32>
    %9 = tpu.matmul %4, %8, %cst_7 {dimension_numbers = #tpu.dot_dimension_numbers<[1], [0], [0], [1], [0, 0, 1, 1], [], []>} : vector<128x128xbf16>, vector<128x32xbf16>, vector<128x32xf32> -> vector<128x32xf32>
    %cst_8 = arith.constant 0.000000e+00 : f32
    %10 = vector.broadcast %cst_8 : f32 to vector<128x32xf32>
    %11 = arith.maximumf %9, %10 : vector<128x32xf32>
    %12 = arith.truncf %11 : vector<128x32xf32> to vector<128x32xbf16>
    %13 = arith.truncf %3 : vector<32x16xf32> to vector<32x16xbf16>
    %cst_9 = arith.constant dense<0.000000e+00> : vector<128x16xf32>
    %14 = tpu.matmul %12, %13, %cst_9 {dimension_numbers = #tpu.dot_dimension_numbers<[1], [0], [0], [1], [0, 0, 1, 1], [], []>} : vector<128x32xbf16>, vector<32x16xbf16>, vector<128x16xf32> -> vector<128x16xf32>
    %15 = arith.truncf %14 : vector<128x16xf32> to vector<128x16xbf16>
    %cst_10 = arith.constant dense<0.000000e+00> : vector<128x16xf32>
    %16 = tpu.matmul %4, %15, %cst_10 {dimension_numbers = #tpu.dot_dimension_numbers<[1], [0], [0], [1], [0, 0, 1, 1], [], []>} : vector<128x128xbf16>, vector<128x16xbf16>, vector<128x16xf32> -> vector<128x16xf32>
    %cst_11 = arith.constant 0.000000e+00 : f32
    %17 = vector.broadcast %cst_11 : f32 to vector<128x16xf32>
    %18 = arith.maximumf %16, %17 : vector<128x16xf32>
    %c0_12 = arith.constant 0 : index
    %c0_13 = arith.constant 0 : index
    %19 = vector.load %arg4[%c0_12, %c0_13] : memref<128x16xf32, #tpu.memory_space<vmem>>, vector<128x16xf32>
    tpu.vector_store %arg4[%c0_12, %c0_13], %18 {strides = array<i32>} : memref<128x16xf32, #tpu.memory_space<vmem>>, vector<128x16xf32>,
    return
  }
}

</mosaic_0001>

<bundles_post_ra>
// kernel: tpu_custom_call.1
= control target key start
LH: loop header
LB: loop body
LE: loop exit
PB: predicated region body
PF: predicated region fallthrough
CT: control target
= control target key end

     0   :  { %vm76_vm0 = vcmask 261120   ;;  %vm571_vm1 = vcmask 130048   ;;  %s1033_s2 = inlined_call_operand.vmem [shape: f32[32,32], index: 2, kind: input, shape index: {}]   ;;  %s1034_s0 = inlined_call_operand.vmem [shape: f32[128,32], index: 0, kind: input, shape index: {}]   ;;  %s1035_s1 = inlined_call_operand.vmem [shape: f32[128,128], index: 1, kind: input, shape index: {}]   ;;  %s1036_s3 = inlined_call_operand.vmem [shape: f32[32,16], index: 3, kind: input, shape index: {}]   ;;  %s1037_s4 = inlined_call_operand.vmem [shape: f32[128,16], index: 4, kind: output, shape index: {}]  }
   0x1   :  { %v52_v0 = vld [vmem:[%s1033_s2 + $0x10] sm:$0xff]  ;;  %v53_v1 = vld [vmem:[%s1033_s2 + $0x18] sm:$0xff]  ;;  %v50_v2 = vld [vmem:[%s1033_s2] sm:$0xff] }
   0x2   :  { %v75_v3 = vpack.c.bf16 %v53_v1, %v52_v0  ;;  %v51_v4 = vld [vmem:[%s1033_s2 + $0x8] sm:$0xff]  ;;  %v18_v5 = vld [vmem:[%s1034_s0] sm:$0xff]  ;;  %v20_v9 = vld [vmem:[%s1034_s0 + $0x10] sm:$0xff] }
   0x3   :  { %v19_v6 = vld [vmem:[%s1034_s0 + $0x8] sm:$0xff]  ;;  %v74_v7 = vpack.c.bf16 %v51_v4, %v50_v2  ;;  %v21_v10 = vld [vmem:[%s1034_s0 + $0x18] sm:$0xff]  ;;  %v22_v11 = vld [vmem:[%s1034_s0 + $0x20] sm:$0xff] }
   0x4   :  { %v66_v8 = vpack.c.bf16 %v19_v6, %v18_v5  ;;  %660 = vmatprep.subr.bf16.mxu0 %v75_v3  ;;  %v23_v12 = vld [vmem:[%s1034_s0 + $0x28] sm:$0xff]  ;;  %v67_v13 = vpack.c.bf16 %v21_v10, %v20_v9  ;;  %v24_v15 = vld [vmem:[%s1034_s0 + $0x30] sm:$0xff]  ;;  %v25_v16 = vld [vmem:[%s1034_s0 + $0x38] sm:$0xff] }
   0x5   :  { %661 = vmatpush3.bf16.msra.mxu0 %v75_v3  ;;  %v68_v14 = vpack.c.bf16 %v23_v12, %v22_v11  ;;  %v26_v17 = vld [vmem:[%s1034_s0 + $0x40] sm:$0xff]  ;;  %v27_v18 = vld [vmem:[%s1034_s0 + $0x48] sm:$0xff]  ;;  %v69_v19 = vpack.c.bf16 %v25_v16, %v24_v15  ;;  %v28_v21 = vld [vmem:[%s1034_s0 + $0x50] sm:$0xff] }
   0x6   :  { %664 = vmatprep.mubr.msk.bf16.mxu0 %vm76_vm0, %v66_v8  ;;  %662 = vmatprep.subr.bf16.mxu0 %v74_v7  ;;  %v70_v20 = vpack.c.bf16 %v27_v18, %v26_v17  ;;  %v29_v22 = vld [vmem:[%s1034_s0 + $0x58] sm:$0xff]  ;;  %v30_v23 = vld [vmem:[%s1034_s0 + $0x60] sm:$0xff]  ;;  %v31_v24 = vld [vmem:[%s1034_s0 + $0x68] sm:$0xff] }
   0x7   :  { %v71_v25 = vpack.c.bf16 %v29_v22, %v28_v21  ;;  %v72_v26 = vpack.c.bf16 %v31_v24, %v30_v23  ;;  %v32_v27 = vld [vmem:[%s1034_s0 + $0x70] sm:$0xff]  ;;  %v33_v28 = vld [vmem:[%s1034_s0 + $0x78] sm:$0xff]  ;;  %v34_v30 = vld [vmem:[%s1035_s1] sm:$0xff] }
   0x8   :  { %v73_v29 = vpack.c.bf16 %v33_v28, %v32_v27  ;;  %v35_v31 = vld [vmem:[%s1035_s1 + $0x8] sm:$0xff]  ;;  %v56_v33 = vld [vmem:[%s1036_s3 + $0x10] sm:$0xff]  ;;  %v57_v34 = vld [vmem:[%s1036_s3 + $0x18] sm:$0xff] }
   0x9   :  { %663 = vmatpush3.bf16.msra.mxu0 %v74_v7  ;;  %v879_v32 = vpack.c.bf16 %v35_v31, %v34_v30  ;;  %v54_v35 = vld [vmem:[%s1036_s3] sm:$0xff]  ;;  %v328_v36 = vpack.c.bf16 %v57_v34, %v56_v33  ;;  %v55_v37 = vld [vmem:[%s1036_s3 + $0x8] sm:$0xff]  ;;  %v36_v63 = vld [vmem:[%s1035_s1 + $0x10] sm:$0xff] }
   0xa   :  { %v327_v38 = vpack.c.bf16 %v55_v37, %v54_v35  ;;  %v37_v0 = vld [vmem:[%s1035_s1 + $0x18] sm:$0xff]  ;;  %v38_v1 = vld [vmem:[%s1035_s1 + $0x20] sm:$0xff]  ;;  %v39_v2 = vld [vmem:[%s1035_s1 + $0x28] sm:$0xff] }
   0xb   :  { %696 = vmatprep.mubr.bf16.mxu1 %v879_v32  ;;  %712 = vmatprep.subr.bf16.mxu0 %v328_v36  ;;  %v906_v3 = vpack.c.bf16 %v37_v0, %v36_v63  ;;  %v60_v4 = vpack.c.bf16 %v39_v2, %v38_v1  ;;  %v40_v5 = vld [vmem:[%s1035_s1 + $0x30] sm:$0xff]  ;;  %v41_v6 = vld [vmem:[%s1035_s1 + $0x38] sm:$0xff]  ;;  %v42_v7 = vld [vmem:[%s1035_s1 + $0x40] sm:$0xff] }
   0xc   :  { %665 = vmatmul.mubr.msk.bf16.vlgmr.msra.gmra.mxu0 %vm76_vm0, %v67_v13  ;;  %v43_v8 = vld [vmem:[%s1035_s1 + $0x48] sm:$0xff]  ;;  %v921_v9 = vpack.c.bf16 %v41_v6, %v40_v5  ;;  %v44_v11 = vld [vmem:[%s1035_s1 + $0x50] sm:$0xff]  ;;  %v45_v12 = vld [vmem:[%s1035_s1 + $0x58] sm:$0xff] }
   0xd   :  { %668 = vmatprep.mubr.msk.bf16.mxu0 %vm76_vm0, %v68_v14  ;;  %713 = vmatpush3.bf16.msra.mxu0 %v328_v36  ;;  %v923_v10 = vpack.c.bf16 %v43_v8, %v42_v7  ;;  %v46_v13 = vld [vmem:[%s1035_s1 + $0x60] sm:$0xff]  ;;  %v47_v14 = vld [vmem:[%s1035_s1 + $0x68] sm:$0xff]  ;;  %v939_v15 = vpack.c.bf16 %v45_v12, %v44_v11  ;;  %v48_v17 = vld [vmem:[%s1035_s1 + $0x70] sm:$0xff] }
   0xe   :  { %714 = vmatprep.subr.bf16.mxu0 %v327_v38  ;;  %v941_v16 = vpack.c.bf16 %v47_v14, %v46_v13  ;;  %v49_v18 = vld [vmem:[%s1035_s1 + $0x78] sm:$0xff] }
  0x11   :  { %715 = vmatpush3.bf16.msra.mxu0 %v327_v38 }
  0x14   :  { %669 = vmatmul.mubr.msk.bf16.gmra.mxu0 %vm76_vm0, %v69_v19  ;;  %v951_v19 = vpack.c.bf16 %v49_v18, %v48_v17 }
  0x15   :  { %672 = vmatprep.mubr.msk.bf16.mxu0 %vm76_vm0, %v70_v20 }
  0x1c   :  { %673 = vmatmul.mubr.msk.bf16.gmra.mxu0 %vm76_vm0, %v71_v25 }
  0x1d   :  { %676 = vmatprep.mubr.msk.bf16.mxu0 %vm76_vm0, %v72_v26 }
  0x24   :  { %677 = vmatmul.mubr.msk.bf16.gmra.mxu0 %vm76_vm0, %v73_v29 }
  0xcc   :  { %v666_v39 = vpop.f32.mrf.mxu0 }
  0xce   :  { %v135_v40 = vpop.f32.mrf.mxu0 }
  0xd0   :  { %v667_v41 = vpop.f32.mrf.mxu0 }
  0xd1   :  { %v199_v61 = vpack.c.bf16 %v667_v41, %v666_v39 }
  0xd2   :  { %v138_v42 = vpop.f32.mrf.mxu0 }
  0xd3   :  { %v198_v62 = vpack.c.bf16 %v138_v42, %v135_v40 }
  0xd4   :  { %v670_v43 = vpop.f32.mrf.mxu0 }
  0xd6   :  { %v151_v44 = vpop.f32.mrf.mxu0 }
  0xd8   :  { %v671_v45 = vpop.f32.mrf.mxu0 }
  0xd9   :  { %v201_v59 = vpack.c.bf16 %v671_v45, %v670_v43 }
  0xda   :  { %v154_v46 = vpop.f32.mrf.mxu0 }
  0xdb   :  { %v200_v60 = vpack.c.bf16 %v154_v46, %v151_v44 }
  0xdc   :  { %v674_v47 = vpop.f32.mrf.mxu0 }
  0xde   :  { %v167_v48 = vpop.f32.mrf.mxu0 }
  0xe0   :  { %v675_v49 = vpop.f32.mrf.mxu0 }
  0xe1   :  { %v203_v57 = vpack.c.bf16 %v675_v49, %v674_v47 }
  0xe2   :  { %v170_v50 = vpop.f32.mrf.mxu0 }
  0xe3   :  { %v202_v58 = vpack.c.bf16 %v170_v50, %v167_v48 }
  0xe4   :  { %v678_v51 = vpop.f32.mrf.mxu0 }
  0xe6   :  { %v183_v52 = vpop.f32.mrf.mxu0 }
  0xe8   :  { %v679_v53 = vpop.f32.mrf.mxu0 }
  0xe9   :  { %v205_v54 = vpack.c.bf16 %v679_v53, %v678_v51 }
  0xea   :  { %v186_v55 = vpop.f32.mrf.mxu0 }
  0xeb   :  { %v204_v56 = vpack.c.bf16 %v186_v55, %v183_v52  ;;  %680 = vmatprep.subr.bf16.mxu1 %v205_v54 }
  0xec   :  { %681 = vmatpush3.bf16.msra.mxu1 %v205_v54 }
  0xed   :  { %682 = vmatprep.subr.bf16.mxu1 %v204_v56 }
  0xf0   :  { %683 = vmatpush3.bf16.msra.mxu1 %v204_v56 }
  0xf1   :  { %684 = vmatprep.subr.bf16.mxu1 %v203_v57 }
  0xf4   :  { %685 = vmatpush3.bf16.msra.mxu1 %v203_v57 }
  0xf5   :  { %686 = vmatprep.subr.bf16.mxu1 %v202_v58 }
  0xf8   :  { %687 = vmatpush3.bf16.msra.mxu1 %v202_v58 }
  0xf9   :  { %688 = vmatprep.subr.bf16.mxu1 %v201_v59 }
  0xfc   :  { %689 = vmatpush3.bf16.msra.mxu1 %v201_v59 }
  0xfd   :  { %690 = vmatprep.subr.bf16.mxu1 %v200_v60 }
 0x100   :  { %691 = vmatpush3.bf16.msra.mxu1 %v200_v60 }
 0x101   :  { %692 = vmatprep.subr.bf16.mxu1 %v199_v61 }
 0x104   :  { %693 = vmatpush3.bf16.msra.mxu1 %v199_v61 }
 0x105   :  { %694 = vmatprep.subr.bf16.mxu1 %v198_v62 }
 0x108   :  { %695 = vmatpush3.bf16.msra.mxu1 %v198_v62 }
 0x10b   :  { %697 = vmatmul.mubr.bf16.vlgmr.msra.gmra.mxu1 %v906_v3 }
 0x10c   :  { %700 = vmatprep.mubr.bf16.mxu1 %v60_v4 }
 0x113   :  { %701 = vmatmul.mubr.bf16.gmra.mxu1 %v921_v9 }
 0x114   :  { %704 = vmatprep.mubr.bf16.mxu1 %v923_v10 }
 0x11b   :  { %705 = vmatmul.mubr.bf16.gmra.mxu1 %v939_v15 }
 0x11c   :  { %708 = vmatprep.mubr.bf16.mxu1 %v941_v16 }
 0x123   :  { %709 = vmatmul.mubr.bf16.gmra.mxu1 %v951_v19 }
 0x124   :  { %752 = vmatprep.mubr.bf16.mxu1 %v60_v4 }
 0x1cb   :  { %v698_v20 = vpop.f32.mrf.mxu1 }
 0x1cc   :  { %v305_v27 = vmax.f32 %v698_v20, 0.0 }
 0x1cd   :  { %v240_v21 = vpop.f32.mrf.mxu1 }
 0x1ce   :  { %v303_v25 = vmax.f32 %v240_v21, 0.0 }
 0x1cf   :  { %v699_v22 = vpop.f32.mrf.mxu1 }
 0x1d0   :  { %v306_v23 = vmax.f32 %v699_v22, 0.0 }
 0x1d1   :  { %v243_v24 = vpop.f32.mrf.mxu1 }
 0x1d2   :  { %v304_v26 = vmax.f32 %v243_v24, 0.0  ;;  %v320_v30 = vpack.c.bf16 %v306_v23, %v305_v27 }
 0x1d3   :  { %v702_v28 = vpop.f32.mrf.mxu1 }
 0x1d4   :  { %v319_v29 = vpack.c.bf16 %v304_v26, %v303_v25  ;;  %v309_v38 = vmax.f32 %v702_v28, 0.0 }
 0x1d5   :  { %v256_v31 = vpop.f32.mrf.mxu1 }
 0x1d6   :  { %716 = vmatprep.mubr.msk.bf16.mxu0 %vm76_vm0, %v319_v29  ;;  %v307_v36 = vmax.f32 %v256_v31, 0.0 }
 0x1d7   :  { %v703_v33 = vpop.f32.mrf.mxu1  ;;  %717 = vmatmul.mubr.msk.bf16.vlgmr.msra.gmra.mxu0 %vm76_vm0, %v320_v30 }
 0x1d8   :  { %v310_v34 = vmax.f32 %v703_v33, 0.0 }
 0x1d9   :  { %v259_v35 = vpop.f32.mrf.mxu1 }
 0x1da   :  { %v308_v37 = vmax.f32 %v259_v35, 0.0  ;;  %v322_v41 = vpack.c.bf16 %v310_v34, %v309_v38 }
 0x1db   :  { %v706_v39 = vpop.f32.mrf.mxu1 }
 0x1dc   :  { %v321_v40 = vpack.c.bf16 %v308_v37, %v307_v36  ;;  %v313_v48 = vmax.f32 %v706_v39, 0.0 }
 0x1dd   :  { %v272_v42 = vpop.f32.mrf.mxu1 }
 0x1de   :  { %720 = vmatprep.mubr.msk.bf16.mxu0 %vm76_vm0, %v321_v40  ;;  %v311_v46 = vmax.f32 %v272_v42, 0.0 }
 0x1df   :  { %v707_v43 = vpop.f32.mrf.mxu1  ;;  %721 = vmatmul.mubr.msk.bf16.gmra.mxu0 %vm76_vm0, %v322_v41 }
 0x1e0   :  { %v314_v44 = vmax.f32 %v707_v43, 0.0 }
 0x1e1   :  { %v275_v45 = vpop.f32.mrf.mxu1 }
 0x1e2   :  { %v312_v47 = vmax.f32 %v275_v45, 0.0  ;;  %v324_v51 = vpack.c.bf16 %v314_v44, %v313_v48 }
 0x1e3   :  { %v710_v49 = vpop.f32.mrf.mxu1 }
 0x1e4   :  { %v323_v50 = vpack.c.bf16 %v312_v47, %v311_v46  ;;  %v317_v58 = vmax.f32 %v710_v49, 0.0 }
 0x1e5   :  { %v288_v52 = vpop.f32.mrf.mxu1 }
 0x1e6   :  { %724 = vmatprep.mubr.msk.bf16.mxu0 %vm76_vm0, %v323_v50  ;;  %v315_v56 = vmax.f32 %v288_v52, 0.0 }
 0x1e7   :  { %v711_v53 = vpop.f32.mrf.mxu1  ;;  %725 = vmatmul.mubr.msk.bf16.gmra.mxu0 %vm76_vm0, %v324_v51 }
 0x1e8   :  { %v318_v54 = vmax.f32 %v711_v53, 0.0 }
 0x1e9   :  { %v291_v55 = vpop.f32.mrf.mxu1 }
 0x1ea   :  { %v316_v57 = vmax.f32 %v291_v55, 0.0  ;;  %v326_v60 = vpack.c.bf16 %v318_v54, %v317_v58 }
 0x1ec   :  { %v325_v59 = vpack.c.bf16 %v316_v57, %v315_v56 }
 0x1ee   :  { %728 = vmatprep.mubr.msk.bf16.mxu0 %vm76_vm0, %v325_v59 }
 0x1ef   :  { %729 = vmatmul.mubr.msk.bf16.gmra.mxu0 %vm76_vm0, %v326_v60 }
 0x1f0   :  { %748 = vmatprep.mubr.bf16.mxu0 %v879_v32 }
 0x297   :  { %v718_v61 = vpop.f32.mrf.mxu0 }
 0x299   :  { %v387_v62 = vpop.f32.mrf.mxu0 }
 0x29b   :  { %v719_v63 = vpop.f32.mrf.mxu0 }
 0x29c   :  { %v451_v24 = vpack.c.bf16 %v719_v63, %v718_v61 }
 0x29d   :  { %v390_v0 = vpop.f32.mrf.mxu0 }
 0x29e   :  { %v450_v25 = vpack.c.bf16 %v390_v0, %v387_v62 }
 0x29f   :  { %v722_v1 = vpop.f32.mrf.mxu0 }
 0x2a1   :  { %v403_v2 = vpop.f32.mrf.mxu0 }
 0x2a3   :  { %v723_v4 = vpop.f32.mrf.mxu0 }
 0x2a4   :  { %v453_v22 = vpack.c.bf16 %v723_v4, %v722_v1 }
 0x2a5   :  { %v406_v5 = vpop.f32.mrf.mxu0 }
 0x2a6   :  { %v452_v23 = vpack.c.bf16 %v406_v5, %v403_v2 }
 0x2a7   :  { %v726_v6 = vpop.f32.mrf.mxu0 }
 0x2a9   :  { %v419_v7 = vpop.f32.mrf.mxu0 }
 0x2ab   :  { %v727_v8 = vpop.f32.mrf.mxu0 }
 0x2ac   :  { %v455_v32 = vpack.c.bf16 %v727_v8, %v726_v6 }
 0x2ad   :  { %v422_v11 = vpop.f32.mrf.mxu0 }
 0x2ae   :  { %v454_v21 = vpack.c.bf16 %v422_v11, %v419_v7 }
 0x2af   :  { %v730_v12 = vpop.f32.mrf.mxu0 }
 0x2b1   :  { %v435_v13 = vpop.f32.mrf.mxu0 }
 0x2b3   :  { %v731_v14 = vpop.f32.mrf.mxu0 }
 0x2b4   :  { %v457_v17 = vpack.c.bf16 %v731_v14, %v730_v12 }
 0x2b5   :  { %v438_v18 = vpop.f32.mrf.mxu0 }
 0x2b6   :  { %v456_v20 = vpack.c.bf16 %v438_v18, %v435_v13  ;;  %732 = vmatprep.subr.bf16.mxu0 %v457_v17  ;;  %764 = vmatprep.subr.bf16.mxu1 %v457_v17 }
 0x2b7   :  { %733 = vmatpush3.bf16.msra.mxu0 %v457_v17  ;;  %772 = vmatpush3.bf16.msra.mxu1 %v457_v17 }
 0x2b8   :  { %734 = vmatprep.subr.bf16.mxu0 %v456_v20  ;;  %765 = vmatprep.subr.bf16.mxu1 %v456_v20 }
 0x2bb   :  { %735 = vmatpush3.bf16.msra.mxu0 %v456_v20  ;;  %773 = vmatpush3.bf16.msra.mxu1 %v456_v20 }
 0x2bc   :  { %736 = vmatprep.subr.bf16.mxu0 %v455_v32  ;;  %766 = vmatprep.subr.bf16.mxu1 %v455_v32 }
 0x2bf   :  { %737 = vmatpush3.bf16.msra.mxu0 %v455_v32  ;;  %774 = vmatpush3.bf16.msra.mxu1 %v455_v32 }
 0x2c0   :  { %738 = vmatprep.subr.bf16.mxu0 %v454_v21  ;;  %767 = vmatprep.subr.bf16.mxu1 %v454_v21 }
 0x2c3   :  { %739 = vmatpush3.bf16.msra.mxu0 %v454_v21  ;;  %775 = vmatpush3.bf16.msra.mxu1 %v454_v21 }
 0x2c4   :  { %740 = vmatprep.subr.bf16.mxu0 %v453_v22  ;;  %768 = vmatprep.subr.bf16.mxu1 %v453_v22 }
 0x2c7   :  { %741 = vmatpush3.bf16.msra.mxu0 %v453_v22  ;;  %776 = vmatpush3.bf16.msra.mxu1 %v453_v22 }
 0x2c8   :  { %742 = vmatprep.subr.bf16.mxu0 %v452_v23  ;;  %769 = vmatprep.subr.bf16.mxu1 %v452_v23 }
 0x2cb   :  { %743 = vmatpush3.bf16.msra.mxu0 %v452_v23  ;;  %777 = vmatpush3.bf16.msra.mxu1 %v452_v23 }
 0x2cc   :  { %744 = vmatprep.subr.bf16.mxu0 %v451_v24  ;;  %770 = vmatprep.subr.bf16.mxu1 %v451_v24 }
 0x2cf   :  { %745 = vmatpush3.bf16.msra.mxu0 %v451_v24  ;;  %778 = vmatpush3.bf16.msra.mxu1 %v451_v24 }
 0x2d0   :  { %746 = vmatprep.subr.bf16.mxu0 %v450_v25  ;;  %771 = vmatprep.subr.bf16.mxu1 %v450_v25 }
 0x2d3   :  { %747 = vmatpush3.bf16.msra.mxu0 %v450_v25  ;;  %779 = vmatpush3.bf16.msra.mxu1 %v450_v25 }
 0x2d6   :  { %753 = vmatmul.mubr.bf16.vlgmr.msra.gmra.mxu1 %v921_v9  ;;  %749 = vmatmul.mubr.bf16.vlgmr.msra.gmra.mxu0 %v906_v3 }
 0x2d7   :  { %756 = vmatprep.mubr.bf16.mxu1 %v923_v10 }
 0x2de   :  { %757 = vmatmul.mubr.bf16.gmra.mxu1 %v939_v15 }
 0x2df   :  { %760 = vmatprep.mubr.bf16.mxu1 %v941_v16 }
 0x2e6   :  { %761 = vmatmul.mubr.bf16.gmra.mxu1 %v951_v19 }
 0x396   :  { %v754_v26 = vpop.f32.mrf.mxu1  ;;  %v750_v27 = vpop.f32.mrf.mxu0 }
 0x397   :  { %v561_v28 = vmax.f32 %v754_v26, 0.0  ;;  %v557_v29 = vmax.f32 %v750_v27, 0.0 }
 0x398   :  { %v508_v30 = vpop.f32.mrf.mxu1  ;;  %v492_v31 = vpop.f32.mrf.mxu0 }
 0x399   :  { %578 = vst.msk [vmem:[%s1037_s4 + $0x30] sm:$0xff] %vm571_vm1, %v561_v28  ;;  %v559_v3 = vmax.f32 %v508_v30, 0.0  ;;  %574 = vst.msk [vmem:[%s1037_s4 + $0x10] sm:$0xff] %vm571_vm1, %v557_v29  ;;  %v555_v9 = vmax.f32 %v492_v31, 0.0 }
 0x39a   :  { %v755_v10 = vpop.f32.mrf.mxu1  ;;  %v751_v15 = vpop.f32.mrf.mxu0 }
 0x39b   :  { %576 = vst.msk [vmem:[%s1037_s4 + $0x20] sm:$0xff] %vm571_vm1, %v559_v3  ;;  %v562_v16 = vmax.f32 %v755_v10, 0.0  ;;  %572 = vst.msk [vmem:[%s1037_s4] sm:$0xff] %vm571_vm1, %v555_v9  ;;  %v558_v19 = vmax.f32 %v751_v15, 0.0 }
 0x39c   :  { %v511_v33 = vpop.f32.mrf.mxu1  ;;  %v495_v34 = vpop.f32.mrf.mxu0 }
 0x39d   :  { %579 = vst.msk [vmem:[%s1037_s4 + $0x38] sm:$0xff] %vm571_vm1, %v562_v16  ;;  %v560_v35 = vmax.f32 %v511_v33, 0.0  ;;  %575 = vst.msk [vmem:[%s1037_s4 + $0x18] sm:$0xff] %vm571_vm1, %v558_v19  ;;  %v556_v36 = vmax.f32 %v495_v34, 0.0 }
 0x39e   :  { %v758_v37 = vpop.f32.mrf.mxu1 }
 0x39f   :  { %577 = vst.msk [vmem:[%s1037_s4 + $0x28] sm:$0xff] %vm571_vm1, %v560_v35  ;;  %v565_v38 = vmax.f32 %v758_v37, 0.0  ;;  %573 = vst.msk [vmem:[%s1037_s4 + $0x8] sm:$0xff] %vm571_vm1, %v556_v36 }
 0x3a0   :  { %v524_v39 = vpop.f32.mrf.mxu1 }
 0x3a1   :  { %582 = vst.msk [vmem:[%s1037_s4 + $0x50] sm:$0xff] %vm571_vm1, %v565_v38  ;;  %v563_v40 = vmax.f32 %v524_v39, 0.0 }
 0x3a2   :  { %v759_v41 = vpop.f32.mrf.mxu1 }
 0x3a3   :  { %580 = vst.msk [vmem:[%s1037_s4 + $0x40] sm:$0xff] %vm571_vm1, %v563_v40  ;;  %v566_v42 = vmax.f32 %v759_v41, 0.0 }
 0x3a4   :  { %v527_v43 = vpop.f32.mrf.mxu1 }
 0x3a5   :  { %583 = vst.msk [vmem:[%s1037_s4 + $0x58] sm:$0xff] %vm571_vm1, %v566_v42  ;;  %v564_v44 = vmax.f32 %v527_v43, 0.0 }
 0x3a6   :  { %v762_v45 = vpop.f32.mrf.mxu1 }
 0x3a7   :  { %581 = vst.msk [vmem:[%s1037_s4 + $0x48] sm:$0xff] %vm571_vm1, %v564_v44  ;;  %v569_v46 = vmax.f32 %v762_v45, 0.0 }
 0x3a8   :  { %v540_v47 = vpop.f32.mrf.mxu1 }
 0x3a9   :  { %586 = vst.msk [vmem:[%s1037_s4 + $0x70] sm:$0xff] %vm571_vm1, %v569_v46  ;;  %v567_v48 = vmax.f32 %v540_v47, 0.0 }
 0x3aa   :  { %v763_v49 = vpop.f32.mrf.mxu1 }
 0x3ab   :  { %584 = vst.msk [vmem:[%s1037_s4 + $0x60] sm:$0xff] %vm571_vm1, %v567_v48  ;;  %v570_v50 = vmax.f32 %v763_v49, 0.0 }
 0x3ac   :  { %v543_v51 = vpop.f32.mrf.mxu1 }
 0x3ad   :  { %587 = vst.msk [vmem:[%s1037_s4 + $0x78] sm:$0xff] %vm571_vm1, %v570_v50  ;;  %v568_v52 = vmax.f32 %v543_v51, 0.0 }
 0x3af   :  { %585 = vst.msk [vmem:[%s1037_s4 + $0x68] sm:$0xff] %vm571_vm1, %v568_v52 }

</bundles_post_ra>
